<compile_context>
chip_gen: v7x
topology: tpu7x:2x2x1
jax: 0.10.0
libtpu: 0.0.40
codegen_flags: <defaults>
</compile_context>

<pallas_src>
import jax
import jax.numpy as jnp
from jax.experimental import pallas as pl
from jax.experimental.pallas import tpu as pltpu


def _round_up(x, m):
    return ((x + m - 1) // m) * m


def _pad_last(x, target):
    pad = target - x.shape[-1]
    if pad == 0:
        return x
    return jnp.pad(x, [(0, 0)] * (x.ndim - 1) + [(0, pad)])


# ------------------------------------ kernels ---------------------------------------
def _softmax_col(s):
    """Softmax over the sublane (L) axis of an (L, 1) f32 score column."""
    m = jnp.max(s, axis=0, keepdims=True)
    p = jnp.exp(s - m)
    denom = jnp.sum(p, axis=0, keepdims=True)
    return p * pl.reciprocal(denom, approx=True)        # divide -> EUP reciprocal


def _dot_kernel(h_ref, e_ref, aw_ref, ctx_ref):
    e = e_ref[0].astype(jnp.float32)                    # (L, Hp), H on lanes
    h = h_ref[0].astype(jnp.float32)                    # (1, Hp)
    # M=1 score contraction on VPU (mul) + XLU (lane reduce): no MXU push/pop.
    s = jnp.sum(e * h, axis=-1, keepdims=True)          # (L, 1)
    w = _softmax_col(s)                                 # (L, 1)
    aw_ref[0] = w
    ctx_ref[0] = jnp.sum(w * e, axis=0, keepdims=True)  # (1, Hp), sublane reduce


def _general_kernel(h_ref, e_ref, w_ref, aw_ref, ctx_ref):
    e = e_ref[0].astype(jnp.float32)                    # (L, Hp)
    h = h_ref[0]                                        # (1, Hp) f32
    W = w_ref[...]                                      # (Hp, Hp), PyTorch (out, in)
    # Algebraic refactor: scores = <e, h @ W>.  The h·bias term is a per-row constant
    # and cancels in the softmax, so the (L, Hp) energy tensor is never materialized.
    g = jnp.dot(h.astype(W.dtype), W, preferred_element_type=jnp.float32)   # (1, Hp)
    s = jnp.sum(e * g, axis=-1, keepdims=True)          # (L, 1)
    w = _softmax_col(s)
    aw_ref[0] = w
    ctx_ref[0] = jnp.sum(w * e, axis=0, keepdims=True)


def _concat_kernel(h_ref, e_ref, enc_ref, wh_ref, b_ref, v_ref, aw_ref, ctx_ref):
    e = e_ref[0].astype(jnp.float32)                    # (L, Hp)
    enc = enc_ref[0].astype(jnp.float32)                # (L, Hp) loop-invariant, precomputed
    h = h_ref[0]                                        # (1, Hp) f32
    Wh = wh_ref[...]                                    # (Hp, Hp) pre-transposed hidden half
    hid = jnp.dot(h.astype(Wh.dtype), Wh, preferred_element_type=jnp.float32)  # (1, Hp)
    energy = jnp.tanh(enc + hid + b_ref[...].astype(jnp.float32))              # (L, Hp)
    s = jnp.sum(energy * v_ref[...].astype(jnp.float32), axis=-1, keepdims=True)
    w = _softmax_col(s)
    aw_ref[0] = w
    ctx_ref[0] = jnp.sum(w * e, axis=0, keepdims=True)


# --------------------------- one-time / per-utterance prep --------------------------
def prepare_attn_params(method, params, hidden_size, *, cast_bf16=False):
    """ONE-TIME parameter prep (outside the greedy token loop): lane-pad H to a
    multiple of 128, pre-split/pre-transpose Linear weights, optionally store matmul
    operands as bf16 (accumulation stays f32 in-kernel)."""
    H = hidden_size
    Hp = _round_up(H, 128)
    wdt = jnp.bfloat16 if cast_bf16 else jnp.float32
    prep = {"H": H, "Hp": Hp, "cast_bf16": cast_bf16}
    if method == "dot":
        pass
    elif method == "general":
        W = params["w"]                                 # (H, H) PyTorch (out, in)
        # g = h @ W contracts over 'out' (first) dim, so no transpose is needed.
        # The bias is softmax-invariant and dropped from the per-step kernel.
        prep["w"] = jnp.pad(W, ((0, Hp - H), (0, Hp - H))).astype(wdt)
    elif method == "concat":
        W = params["w"]                                 # (H, 2H) PyTorch layout
        wh_t = W[:, :H].T                               # (H_in, H_out) hidden half
        prep["wh_t"] = jnp.pad(wh_t, ((0, Hp - H), (0, Hp - H))).astype(wdt)
        prep["we"] = W[:, H:]                           # encoder half: used only in the
                                                        # per-utterance enc precompute
        prep["b"] = _pad_last(params["b"], Hp).astype(wdt)
        prep["v"] = _pad_last(params["v"], Hp).astype(wdt)
    else:
        raise ValueError(method, "is not an appropriate attention method.")
    return prep


def prepare_encoder_state(method, encoder_outputs, prep):
    """PER-UTTERANCE prep (once per input sequence, outside the token loop): re-lay
    encoder_outputs batch-major with H on lanes, and precompute the loop-invariant
    encoder half of the 'concat' projection."""
    Hp = prep["Hp"]
    edt = jnp.bfloat16 if prep["cast_bf16"] else jnp.float32
    e = jnp.transpose(encoder_outputs, (1, 0, 2))       # (B, L, H)
    state = {"e": _pad_last(e, Hp).astype(edt)}
    if method == "concat":
        enc = jnp.einsum("bli,oi->blo", e, prep["we"])  # (B, L, H), once per utterance
        state["enc"] = _pad_last(enc, Hp).astype(edt)
    return state


# --------------------------------- per-step wrapper ---------------------------------
def attn_and_context_step(method, hidden, enc_state, prep):
    """Fused Attn(method).forward + attn_weights.bmm(encoder_outputs) for ONE decode
    step.  hidden: (1, B, H).  Returns (attn_weights (B,1,L), context (B,1,H)), f32."""
    H, Hp = prep["H"], prep["Hp"]
    e = enc_state["e"]                                  # (B, L, Hp)
    B, L, _ = e.shape
    h3 = _pad_last(jnp.transpose(hidden, (1, 0, 2)), Hp)   # (B, 1, Hp) f32

    def bspec(shp):
        return pl.BlockSpec(shp, lambda b: (b, 0, 0))

    def fixed2(shp):
        return pl.BlockSpec(shp, lambda b: (0, 0))

    h_spec = bspec((1, 1, Hp))
    e_spec = bspec((1, L, Hp))
    out_shape = (jax.ShapeDtypeStruct((B, L, 1), jnp.float32),
                 jax.ShapeDtypeStruct((B, 1, Hp), jnp.float32))
    out_specs = (bspec((1, L, 1)), bspec((1, 1, Hp)))
    cparams = pltpu.CompilerParams(dimension_semantics=("parallel",))
    esize = e.dtype.itemsize
    io_bytes = esize * B * L * Hp + 4 * (2 * B * Hp + B * L)

    if method == "dot":
        cost = pl.CostEstimate(flops=int(4 * B * L * Hp + 6 * B * L),
                               transcendentals=int(B * L + B),
                               bytes_accessed=int(io_bytes))
        aw, ctx = pl.pallas_call(
            _dot_kernel, out_shape=out_shape,
            grid_spec=pltpu.PrefetchScalarGridSpec(
                num_scalar_prefetch=0, grid=(B,),
                in_specs=[h_spec, e_spec], out_specs=out_specs),
            compiler_params=cparams, cost_estimate=cost,
        )(h3, e)
    elif method == "general":
        W = prep["w"]
        cost = pl.CostEstimate(
            flops=int(2 * B * Hp * Hp + 4 * B * L * Hp + 6 * B * L),
            transcendentals=int(B * L + B),
            bytes_accessed=int(io_bytes + W.dtype.itemsize * Hp * Hp))
        aw, ctx = pl.pallas_call(
            _general_kernel, out_shape=out_shape,
            grid_spec=pltpu.PrefetchScalarGridSpec(
                num_scalar_prefetch=0, grid=(B,),
                in_specs=[h_spec, e_spec, fixed2((Hp, Hp))], out_specs=out_specs),
            compiler_params=cparams, cost_estimate=cost,
        )(h3, e, W)
    elif method == "concat":
        enc = enc_state["enc"]
        Wh = prep["wh_t"]
        cost = pl.CostEstimate(
            flops=int(2 * B * Hp * Hp + 8 * B * L * Hp + 6 * B * L),
            transcendentals=int(B * L * Hp + B * L + B),
            bytes_accessed=int(io_bytes + esize * B * L * Hp
                               + Wh.dtype.itemsize * (Hp * Hp + 2 * Hp)))
        aw, ctx = pl.pallas_call(
            _concat_kernel, out_shape=out_shape,
            grid_spec=pltpu.PrefetchScalarGridSpec(
                num_scalar_prefetch=0, grid=(B,),
                in_specs=[h_spec, e_spec, e_spec, fixed2((Hp, Hp)),
                          fixed2((1, Hp)), fixed2((1, Hp))],
                out_specs=out_specs),
            compiler_params=cparams, cost_estimate=cost,
        )(h3, e, enc, Wh, prep["b"], prep["v"])
    else:
        raise ValueError(method, "is not an appropriate attention method.")

    attn_weights = jnp.transpose(aw, (0, 2, 1))         # (B, 1, L) -- tiny relayout
    context = ctx[:, :, :H]                             # strip lane padding
    return attn_weights, context


def attn_and_context(method, hidden, encoder_outputs, params, *, cast_bf16=False):
    """Convenience wrapper.  In the real GreedySearchDecoder loop the two prepare_*
    calls are hoisted (once per model / once per utterance); only
    attn_and_context_step runs per generated token."""
    prep = prepare_attn_params(method, params, hidden.shape[-1], cast_bf16=cast_bf16)
    enc_state = prepare_encoder_state(method, encoder_outputs, prep)
    return attn_and_context_step(method, hidden, enc_state, prep)


# -------------------- pure-JAX reference (for correctness check) --------------------
def attn_context_reference(method, hidden, encoder_outputs, params):
    h = hidden                                          # (1, B, H)
    e = encoder_outputs                                 # (L, B, H)
    if method == "dot":
        scores = jnp.sum(h * e, axis=2)
    elif method == "general":
        energy = jnp.einsum("lbh,oh->lbo", e, params["w"]) + params["b"][0]
        scores = jnp.sum(h * energy, axis=2)
    elif method == "concat":
        cat = jnp.concatenate([jnp.broadcast_to(h, e.shape), e], axis=2)   # (L, B, 2H)
        energy = jnp.tanh(jnp.einsum("lbc,oc->lbo", cat, params["w"]) + params["b"][0])
        scores = jnp.sum(params["v"][0] * energy, axis=2)
    weights = jax.nn.softmax(scores.T, axis=1)[:, None, :]                 # (B, 1, L)
    context = jnp.einsum("bul,blh->buh", weights, jnp.transpose(e, (1, 0, 2)))
    return weights, context


if __name__ == "__main__":
    H = 32   # hidden_size (small synthetic test; module default is 500)
    B = 2    # batch
    L = 8    # encoder sequence length

    key = jax.random.PRNGKey(0)
    k_h, k_e, k_w1, k_b1, k_w2, k_b2, k_v = jax.random.split(key, 7)

    hidden = jax.random.normal(k_h, (1, B, H), dtype=jnp.float32)
    encoder_outputs = jax.random.normal(k_e, (L, B, H), dtype=jnp.float32)

    params = {
        "dot": {},
        "general": {
            "w": jax.random.normal(k_w1, (H, H), dtype=jnp.float32) * 0.1,
            "b": jax.random.normal(k_b1, (1, H), dtype=jnp.float32) * 0.1,
        },
        "concat": {
            "w": jax.random.normal(k_w2, (H, 2 * H), dtype=jnp.float32) * 0.1,
            "b": jax.random.normal(k_b2, (1, H), dtype=jnp.float32) * 0.1,
            "v": jax.random.normal(k_v, (1, H), dtype=jnp.float32) * 0.1,
        },
    }

    for method in ("dot", "general", "concat"):
        aw_exp, ctx_exp = attn_context_reference(method, hidden, encoder_outputs,
                                                 params[method])
        # f32 path (approx-reciprocal softmax + softmax-invariant bias drop -> 2e-3 tol)
        aw, ctx = jax.block_until_ready(
            attn_and_context(method, hidden, encoder_outputs, params[method]))
        assert aw.shape == (B, 1, L), (method, aw.shape)
        assert ctx.shape == (B, 1, H), (method, ctx.shape)
        assert jnp.allclose(aw, aw_exp, atol=2e-3, rtol=2e-3), (method, aw, aw_exp)
        assert jnp.allclose(ctx, ctx_exp, atol=2e-3, rtol=2e-3), (method, ctx, ctx_exp)

        # bf16-storage path (e / enc / weights in bf16, f32 accumulation) -> looser tol
        aw16, ctx16 = jax.block_until_ready(
            attn_and_context(method, hidden, encoder_outputs, params[method],
                             cast_bf16=True))
        assert jnp.allclose(aw16, aw_exp, atol=5e-2, rtol=5e-2), (method,)
        assert jnp.allclose(ctx16, ctx_exp, atol=5e-2, rtol=5e-2), (method,)

    print("KERNEL_OK")
</pallas_src>

<mosaic_0001>
module attributes {stable_mosaic.version = 11 : i64} {
  func.func @_dot_kernel(%arg0: i32, %arg1: memref<1x1x128xf32, #tpu.memory_space<vmem>>, %arg2: memref<1x8x128xf32, #tpu.memory_space<vmem>>, %arg3: memref<1x8x1xf32, #tpu.memory_space<vmem>>, %arg4: memref<1x1x128xf32, #tpu.memory_space<vmem>>) attributes {dimension_semantics = [#tpu.dimension_semantics<parallel>], iteration_bounds = array<i64: 2>, scalar_prefetch = 0 : i64, scratch_operands = 0 : i64, tpu.core_type = #tpu.core_type<tc>, window_params = [{transform_indices = @transform_0, window_bounds = array<i64: 1, 1, 128>}, {transform_indices = @transform_1, window_bounds = array<i64: 1, 8, 128>}, {transform_indices = @transform_2, window_bounds = array<i64: 1, 8, 1>}, {transform_indices = @transform_3, window_bounds = array<i64: 1, 1, 128>}]} {
    %c0 = arith.constant 0 : index
    %c0_0 = arith.constant 0 : index
    %c0_1 = arith.constant 0 : index
    %0 = vector.load %arg2[%c0, %c0_0, %c0_1] : memref<1x8x128xf32, #tpu.memory_space<vmem>>, vector<1x8x128xf32>
    %1 = vector.shape_cast %0 : vector<1x8x128xf32> to vector<8x128xf32>
    %c0_2 = arith.constant 0 : index
    %c0_3 = arith.constant 0 : index
    %c0_4 = arith.constant 0 : index
    %2 = vector.load %arg1[%c0_2, %c0_3, %c0_4] : memref<1x1x128xf32, #tpu.memory_space<vmem>>, vector<1x1x128xf32>
    %3 = vector.shape_cast %2 : vector<1x1x128xf32> to vector<1x128xf32>
    %4 = vector.broadcast %3 : vector<1x128xf32> to vector<8x128xf32>
    %5 = arith.mulf %1, %4 : vector<8x128xf32>
    %cst = arith.constant dense<0.000000e+00> : vector<8xf32>
    %6 = vector.multi_reduction <add>, %5, %cst [1] : vector<8x128xf32> to vector<8xf32>
    %7 = vector.shape_cast %6 : vector<8xf32> to vector<8x1xf32>
    %cst_5 = arith.constant dense<0xFF800000> : vector<1xf32>
    %8 = vector.multi_reduction <maximumf>, %7, %cst_5 [0] : vector<8x1xf32> to vector<1xf32>
    %9 = vector.shape_cast %8 : vector<1xf32> to vector<1x1xf32>
    %10 = vector.broadcast %9 : vector<1x1xf32> to vector<8x1xf32>
    %11 = arith.subf %7, %10 : vector<8x1xf32>
    %12 = math.exp %11 : vector<8x1xf32>
    %cst_6 = arith.constant dense<0.000000e+00> : vector<1xf32>
    %13 = vector.multi_reduction <add>, %12, %cst_6 [0] : vector<8x1xf32> to vector<1xf32>
    %14 = vector.shape_cast %13 : vector<1xf32> to vector<1x1xf32>
    %15 = tpu.reciprocal %14 {approx = true} : vector<1x1xf32> -> vector<1x1xf32>
    %16 = vector.broadcast %15 : vector<1x1xf32> to vector<8x1xf32>
    %17 = arith.mulf %12, %16 : vector<8x1xf32>
    %c0_7 = arith.constant 0 : index
    %c0_8 = arith.constant 0 : index
    %c0_9 = arith.constant 0 : index
    %18 = vector.load %arg3[%c0_7, %c0_8, %c0_9] : memref<1x8x1xf32, #tpu.memory_space<vmem>>, vector<1x8x1xf32>
    %19 = vector.shape_cast %18 : vector<1x8x1xf32> to vector<8x1xf32>
    %20 = vector.shape_cast %17 : vector<8x1xf32> to vector<1x8x1xf32>
    tpu.vector_store %arg3[%c0_7, %c0_8, %c0_9], %20 {strides = array<i32>} : memref<1x8x1xf32, #tpu.memory_space<vmem>>, vector<1x8x1xf32>,
    %21 = vector.broadcast %17 : vector<8x1xf32> to vector<8x128xf32>
    %22 = arith.mulf %21, %1 : vector<8x128xf32>
    %cst_10 = arith.constant dense<0.000000e+00> : vector<128xf32>
    %23 = vector.multi_reduction <add>, %22, %cst_10 [0] : vector<8x128xf32> to vector<128xf32>
    %24 = vector.shape_cast %23 : vector<128xf32> to vector<1x128xf32>
    %c0_11 = arith.constant 0 : index
    %c0_12 = arith.constant 0 : index
    %c0_13 = arith.constant 0 : index
    %25 = vector.load %arg4[%c0_11, %c0_12, %c0_13] : memref<1x1x128xf32, #tpu.memory_space<vmem>>, vector<1x1x128xf32>
    %26 = vector.shape_cast %25 : vector<1x1x128xf32> to vector<1x128xf32>
    %27 = vector.shape_cast %24 : vector<1x128xf32> to vector<1x1x128xf32>
    tpu.vector_store %arg4[%c0_11, %c0_12, %c0_13], %27 {strides = array<i32>} : memref<1x1x128xf32, #tpu.memory_space<vmem>>, vector<1x1x128xf32>,
    return
  }
  func.func @transform_0(%arg0: i32) -> (i32, i32, i32) {
    %c0_i32 = arith.constant 0 : i32
    %c0_i32_0 = arith.constant 0 : i32
    %c0_i32_1 = arith.constant 0 : i32
    return %arg0, %c0_i32, %c0_i32_0 : i32, i32, i32
  }
  func.func @transform_1(%arg0: i32) -> (i32, i32, i32) {
    %c0_i32 = arith.constant 0 : i32
    %c0_i32_0 = arith.constant 0 : i32
    %c0_i32_1 = arith.constant 0 : i32
    return %arg0, %c0_i32, %c0_i32_0 : i32, i32, i32
  }
  func.func @transform_2(%arg0: i32) -> (i32, i32, i32) {
    %c0_i32 = arith.constant 0 : i32
    %c0_i32_0 = arith.constant 0 : i32
    %c0_i32_1 = arith.constant 0 : i32
    return %arg0, %c0_i32, %c0_i32_0 : i32, i32, i32
  }
  func.func @transform_3(%arg0: i32) -> (i32, i32, i32) {
    %c0_i32 = arith.constant 0 : i32
    %c0_i32_0 = arith.constant 0 : i32
    %c0_i32_1 = arith.constant 0 : i32
    return %arg0, %c0_i32, %c0_i32_0 : i32, i32, i32
  }
}

</mosaic_0001>

<bundles_post_ra>
// kernel: tpu_custom_call.1
= control target key start
LH: loop header
LB: loop body
LE: loop exit
PB: predicated region body
PF: predicated region fallthrough
CT: control target
= control target key end

     0   :  { %9 = vsyncpa [#allocation3], 0  ;;  %s831_s0 = inlined_call_operand.hbm [shape: f32[2,1,128], index: 0, kind: input, shape index: {}]   ;;  %s832_s1 = inlined_call_operand.hbm [shape: f32[2,8,128], index: 1, kind: input, shape index: {}]   ;;  %s833_s2 = inlined_call_operand.vmem [shape: f32[2,8,1], index: 2, kind: output, shape index: {0}]   ;;  %s834_s3 = inlined_call_operand.hbm [shape: f32[2,1,128], index: 3, kind: output, shape index: {1}]  }
   0x1   :  { %11 = vsyncpa [#allocation3 + $0x1], 0 }
   0x2   :  { %12 = vsyncpa [#allocation6], 0 }
   0x3   :  { %14 = vsyncpa [#allocation6 + $0x1], 0 }
   0x4   :  { %15 = vsyncpa [#allocation4], 0 }
   0x5   :  { %17 = vsyncpa [#allocation4 + $0x1], 0  ;;  %s621_s12 = smov 0   ;;  %s623_s13 = smov 0  }
   0x6   :  { %s625_s14 = smov 0   ;;  %s627_s15 = smov 0  }
   0x7 LB: > { %s642_s16 = sadd.s32 4294967295, %s596_s15   ;;  %s398_s17 = sadd.s32 4294967294, %s596_s15   ;;  %s596_s15 = sphi %s627_s15, %s853_s15   ;;  %s592_s14 = sphi %s625_s14, %s852_s14   ;;  %s588_s13 = sphi %s623_s13, %s851_s13   ;;  %s584_s12 = sphi %s621_s12, %s850_s12  }
   0x8   : > { %s646_s18 = sadd.s32 1, %s596_s15   ;;  %s30_s19 = sadd.s32 1, %s592_s14 }
   0x9   : > { %s27_s20 = ssub.s32 %s596_s15, %s646_s18  ;;  %p37_p0 = scmp.ne.s32.totalorder %s592_s14, %s588_s13 }
   0xa   : > { %p28_p1 = scmp.eq.s32.totalorder %s27_s20, 0  ;;  %p38_p2 = scmp.eq.s32.totalorder %s596_s15, 0 }
   0xb   : > { %p43_p3 = scmp.ne.s32.totalorder %s588_s13, %s584_s12  ;;  %p44_p4 = scmp.eq.s32.totalorder %s642_s16, 0 }
   0xc   : > { %s658_s21 = scalar_select %p28_p1, %s592_s14, %s30_s19  }
   0xd   : > { %p660_p5 = por %p38_p2, %p37_p0  ;;  %p664_p6 = por %p44_p4, %p43_p3 }
   0xe   : > { %p119_p7 = scmp.eq.s32.totalorder %s642_s16, 1  ;;  %p125_p8 = scmp.eq.s32.totalorder %s398_s17, 1 }
   0xf   : > { %s838_s23 = scalar_select %p664_p6, 1, 0 }
  0x10   : > { %p428_p10 = scmp.lt.s32.totalorder %s596_s15, 2  ;;  %p671_p11 = por %p119_p7, %p37_p0 }
  0x11   : > { %p675_p12 = por %p125_p8, %p43_p3  ;;  %s680_s26 = sand.u32 1, %s592_s14  }
  0x12   : > { %s839_s24 = scalar_select %p671_p11, 1, 0 }
  0x13   : > { %s840_s25 = scalar_select %p675_p12, 1, 0 }
  0x14   : > { %s401_s27 = sshll.u32 %s596_s15, 4  ;;  %s148_s4 = scalar_lea.vmem [#allocation2], %s680_s26 }
  0x15   : > { %s686_s30 = scalar_lea.hbm %s831_s0, %s401_s27  ;;  %s155_s5 = sshll.u32 %s148_s4, 4  ;;  %s689_s5 = int_to_ptr.vmem [resolvable:$true] %s155_s5 }
  0x16   : > { %p693_p13 = pnand %p428_p10, %p660_p5  ;;  %s146_s7 = scalar_lea.sflag [#allocation3], %s680_s26 }
  0x17   : > { %s466_s8 = scalar_lea.hbm %s686_s30, 16  ;;  %s471_s11 = scalar_lea.hbm %s831_s0, 32 }
  0x18   : > { %p467_p2 = scmp.ne.s32.totalorder %s686_s30, %s466_s8  ;;  %p468_p3 = pneg %p693_p13 }
  0x19   : > { %p472_p5 = scmp.lt.u32.totalorder %s686_s30, %s831_s0  ;;  %p473_p8 = scmp.lt.u32.totalorder %s471_s11, %s466_s8 }
  0x1a   : > { %p469_p4 = pnand %p468_p3, %p467_p2  ;;  %p475_p9 = scmp.lt.u32.totalorder %s466_s8, %s686_s30 }
  0x1b   : > { %p474_p10 = por %p473_p8, %p472_p5 }
  0x1c   : > { %p470_p7 = pneg %p469_p4 }
  0x1d   : > { %p476_p0 = por %p475_p9, %p474_p10 }
  0x1f   : > { %p477_p1 = pnand %p476_p0, %p470_p7 }
  0x21   : > { %480 = shalt.err (!%p477_p1)
}
  0x22   : > { %s481_s20 = scalar_lea.vmem %s689_s5, 16  ;;  %s598_s22 = smov [#allocation2]  }
  0x23   : > { %p482_p2 = scmp.ne.s32.totalorder %s689_s5, %s481_s20  ;;  %s486_s27 = sshll.u32 %s598_s22, 4  ;;  %s487_s27 = int_to_ptr.vmem [resolvable:$false] %s486_s27 }
  0x24   : > { %s488_s28 = scalar_lea.vmem %s487_s27, 32  ;;  %p489_p11 = scmp.lt.s32.totalorder %s689_s5, %s487_s27 }
  0x25   : > { %p484_p4 = pnand %p482_p2, %p468_p3  ;;  %p490_p5 = scmp.lt.s32.totalorder %s488_s28, %s481_s20 }
  0x27   : > { %p485_p12 = pneg %p484_p4  ;;  %p491_p8 = por %p490_p5, %p489_p11 }
  0x29   : > { %p492_p9 = pnand %p491_p8, %p485_p12 }
  0x2b   : > { %495 = shalt.err (!%p492_p9)
}
  0x2c   : > { %420 = dma.hbm_to_vmem [thread:$0]  (!%p693_p13), %s686_s30, 16, %s689_s5, %s146_s7  }
  0x2d   : > { %p842_p0 = scmp.lt.s32.totalorder %s596_s15, 3  ;;  %p843_p1 = scmp.ge.s32.totalorder %s596_s15, 1 }
  0x2e   : > { %s402_s4 = sshll.u32 %s680_s26, 3  ;;  %s403_s8 = sshll.u32 %s596_s15, 7 }
  0x2f   : > { %p729_p7 = pnand %p843_p1, %p842_p0  ;;  %s738_s11 = scalar_lea.hbm %s832_s1, %s403_s8 }
  0x30   : > { %s166_s17 = scalar_lea.vmem [#allocation5], %s402_s4  ;;  %s163_s30 = scalar_lea.sflag [#allocation6], %s680_s26 }
  0x31   : > { %s844_s29 = scalar_select %p729_p7, 1, 0 }
  0x32   : > { %s173_s19 = sshll.u32 %s166_s17, 4  ;;  %s496_s5 = scalar_lea.hbm %s738_s11, 128  ;;  %s174_s19 = int_to_ptr.vmem [resolvable:$true] %s173_s19 }
  0x33   : > { %p497_p11 = scmp.ne.s32.totalorder %s738_s11, %s496_s5  ;;  %s501_s22 = scalar_lea.hbm %s832_s1, 256 }
  0x34   : > { %p502_p2 = scmp.lt.u32.totalorder %s738_s11, %s832_s1  ;;  %p503_p4 = scmp.lt.u32.totalorder %s501_s22, %s496_s5 }
  0x35   : > { %p499_p12 = pnand %p497_p11, %p468_p3  ;;  %p505_p8 = scmp.lt.u32.totalorder %s496_s5, %s738_s11 }
  0x36   : > { %p504_p5 = por %p503_p4, %p502_p2 }
  0x37   : > { %p500_p10 = pneg %p499_p12 }
  0x38   : > { %p506_p9 = por %p505_p8, %p504_p5 }
  0x3a   : > { %p507_p0 = pnand %p506_p9, %p500_p10 }
  0x3c   : > { %510 = shalt.err (!%p507_p0)
}
  0x3d   : > { %s511_s26 = scalar_lea.vmem %s174_s19, 128  ;;  %s599_s4 = smov [#allocation5]  }
  0x3e   : > { %p512_p1 = scmp.ne.s32.totalorder %s174_s19, %s511_s26  ;;  %s516_s8 = sshll.u32 %s599_s4, 4  ;;  %s517_s8 = int_to_ptr.vmem [resolvable:$false] %s516_s8 }
  0x3f   : > { %s518_s9 = scalar_lea.vmem %s517_s8, 256  ;;  %p519_p6 = scmp.lt.s32.totalorder %s174_s19, %s517_s8 }
  0x40   : > { %p514_p11 = pnand %p512_p1, %p468_p3  ;;  %p520_p7 = scmp.lt.s32.totalorder %s518_s9, %s511_s26 }
  0x42   : > { %p515_p12 = pneg %p514_p11  ;;  %p521_p2 = por %p520_p7, %p519_p6 }
  0x44   : > { %p522_p4 = pnand %p521_p2, %p515_p12 }
  0x46   : > { %525 = shalt.err (!%p522_p4)
}
  0x47   : > { %423 = dma.hbm_to_vmem [thread:$0]  (!%p693_p13), %s738_s11, 128, %s174_s19, %s163_s30  }
  0x48   : > { %p845_p10 = scmp.ne.s32.totalorder %s844_s29, 0 }
  0x49   : > { %s763_s10 = sand.u32 (!%p845_p10), 1, %s588_s13   ;;  %p846_p3 = scmp.ne.s32.totalorder (!%p845_p10), %s838_s23, 0 }
  0x4a   : > { %182 = sbr.rel (%p845_p10) target bundleno = 311 (0x137), region = 28  ;;  %s185_s17 = scalar_lea.sflag (!%p845_p10), [#allocation3], %s763_s10 }
  0x4b   : > { %s187_s5 = scalar_lea.vmem (!%p845_p10), [#allocation2], %s763_s10 }
  0x51   : > { %571 = dma.done.wait (%p846_p3), %s185_s17, 16  }
  0x52   : > { %573 = vsyncadd (%p846_p3), %s185_s17, 4294967280  ;;  %s405_s6 = sshll.u32 %s763_s10, 3  ;;  %s193_s11 = scalar_lea.sflag [#allocation6], %s763_s10 }
  0x53   : > { %s196_s29 = scalar_lea.vmem [#allocation5], %s405_s6 }
  0x54   : > { %575 = dma.done.wait (%p846_p3), %s193_s11, 128  }
  0x55   : > { %577 = vsyncadd (%p846_p3), %s193_s11, 4294967168  ;;  %v230_v0 = vld [vmem:[%s196_s29] sm:$0xff]  ;;  %p226_p6 = scmp.lt.s32.totalorder %s642_s16, 1  ;;  %vm258_vm0 = vcmask 7168   ;;  %s408_s22 = sshll.u32 %s642_s16, 4 }
  0x56   : > { %v407_v1 = vld [vmem:[%s187_s5] ss:$0 sm:$0xff]  ;;  %s225_s27 = scalar_lea.vmem [#allocation7], %s763_s10  ;;  %s787_s8 = scalar_lea.hbm %s834_s3, %s408_s22 }
  0x57   : > { %v238_v2 = vmul.f32 %v407_v1, %v230_v0  ;;  %s227_s23 = scalar_select %p226_p6, %s642_s16, 1 }
  0x58   : > { %s288_s28 = sshll.u32 %s225_s27, 4  ;;  %s273_s9 = scalar_lea.sflag [#allocation4], %s763_s10  ;;  %s789_s28 = int_to_ptr.vmem [resolvable:$true] %s288_s28 }
  0x59   : > { %239 = vadd.xlane.f32.xlu0 %v238_v2  ;;  %s406_s19 = sshll.u32 %s227_s23, 3  ;;  %s526_s17 = scalar_lea.vmem %s789_s28, 16 }
  0x5a   : > { %s229_s20 = scalar_lea.vmem %s833_s2, %s406_s19  ;;  %p527_p13 = scmp.ne.s32.totalorder %s789_s28, %s526_s17 }
  0x5b   : > { %p847_p7 = scmp.ne.s32.totalorder %s839_s24, 0  ;;  %s600_s16 = smov [#allocation7]  }
  0x5c   : > { %s530_s5 = sshll.u32 %s600_s16, 4  ;;  %s531_s5 = int_to_ptr.vmem [resolvable:$false] %s530_s5 }
  0x5d   : > { %p528_p5 = pnand %p527_p13, %p847_p7  ;;  %s532_s6 = scalar_lea.vmem %s531_s5, 32 }
  0x5e   : > { %p533_p9 = scmp.lt.s32.totalorder %s789_s28, %s531_s5  ;;  %p534_p0 = scmp.lt.s32.totalorder %s532_s6, %s526_s17 }
  0x5f   : > { %p529_p8 = pneg %p528_p5 }
  0x60   : > { %p535_p1 = por %p534_p0, %p533_p9 }
  0x62   : > { %p536_p11 = pnand %p535_p1, %p529_p8 }
  0xe6   : > { %v240_v3 = vpop.xlane.xlu0 %239 }
  0xe7   : > { %v241_v4 = vrot.slane %v240_v3, 4 }
  0xe9   : > { %v242_v5 = vmax.f32 %v240_v3, %v241_v4 }
  0xeb   : > { %v243_v6 = vrot.slane %v242_v5, 2 }
  0xed   : > { %v244_v7 = vmax.f32 %v242_v5, %v243_v6 }
  0xef   : > { %v245_v8 = vrot.slane %v244_v7, 1 }
  0xf1   : > { %v246_v9 = vmax.f32 %v244_v7, %v245_v8 }
  0xf3   : > { %v247_v10 = vsub.f32 %v240_v3, %v246_v9 }
  0xf5   : > { %v248_v11 = vmul.f32 1.442695, %v247_v10 }
  0xf7   : > { %462 = vpow2.f32 %v248_v11 }
 0x101   : > { %v463_v12 = vpop.eup %462 }
 0x102   : > { %v250_v13 = vrot.slane %v463_v12, 4 }
 0x104   : > { %v251_v14 = vadd.f32 %v463_v12, %v250_v13 }
 0x106   : > { %v252_v15 = vrot.slane %v251_v14, 2 }
 0x108   : > { %v253_v16 = vadd.f32 %v252_v15, %v251_v14 }
 0x10a   : > { %v254_v17 = vrot.slane %v253_v16, 1 }
 0x10c   : > { %v255_v18 = vadd.f32 %v254_v17, %v253_v16 }
 0x10e   : > { %464 = vrcp.f32 %v255_v18 }
 0x118   : > { %v465_v19 = vpop.eup %464 }
 0x119   : > { %v257_v20 = vmul.f32 %v465_v19, %v463_v12 }
 0x11b   : > { %259 = vst.msk [vmem:[%s229_s20] sm:$0xff] %vm258_vm0, %v257_v20  ;;  %v260_v21 = vmul.f32 %v257_v20, %v230_v0 }
 0x11d   : > { %v261_v22 = vrot.slane %v260_v21, 4 }
 0x11f   : > { %v262_v23 = vadd.f32 %v261_v22, %v260_v21 }
 0x121   : > { %v263_v24 = vrot.slane %v262_v23, 2 }
 0x123   : > { %v264_v25 = vadd.f32 %v263_v24, %v262_v23 }
 0x125   : > { %v265_v26 = vrot.slane %v264_v25, 1 }
 0x127   : > { %v266_v27 = vadd.f32 %v265_v26, %v264_v25 }
 0x129   : > { %267 = vst [vmem:[%s225_s27] sm:$0x1] %v266_v27 }
 0x12a   : > { %539 = shalt.err (!%p536_p11)
}
 0x12b   : > { %s540_s10 = scalar_lea.hbm %s787_s8, 16  ;;  %s544_s23 = scalar_lea.hbm %s834_s3, 32 }
 0x12c   : > { %p541_p12 = scmp.ne.s32.totalorder %s787_s8, %s540_s10  ;;  %p545_p10 = scmp.lt.u32.totalorder %s787_s8, %s834_s3 }
 0x12d   : > { %p546_p3 = scmp.lt.u32.totalorder %s544_s23, %s540_s10  ;;  %p548_p13 = scmp.lt.u32.totalorder %s540_s10, %s787_s8 }
 0x12e   : > { %p542_p2 = pnand %p541_p12, %p847_p7 }
 0x12f   : > { %p547_p6 = por %p546_p3, %p545_p10 }
 0x130   : > { %p543_p4 = pneg %p542_p2 }
 0x131   : > { %p549_p5 = por %p548_p13, %p547_p6 }
 0x133   : > { %p550_p8 = pnand %p549_p5, %p543_p4 }
 0x135   : > { %553 = shalt.err (!%p550_p8)
}
 0x136   : > { %415 = dma.vmem_to_hbm [thread:$0]  (%p847_p7), %s789_s28, 16, %s787_s8, %s273_s9  }
 0x137 PF: > { %s307_s7 = sand.u32 1, %s584_s12   ;;  %p848_p9 = scmp.ne.s32.totalorder %s840_s25, 0 }
 0x138   : > { %p849_p0 = scmp.ge.s32.totalorder %s596_s15, 2  ;;  %s308_s20 = scalar_lea.sflag [#allocation4], %s307_s7 }
 0x13a   : > { %p425_p1 = pnand %p849_p0, %p848_p9 }
 0x13c   : > { %579 = dma.done.wait (!%p425_p1), %s308_s20, 16  }
 0x13d   : > { %581 = vsyncadd (!%p425_p1), %s308_s20, 4294967280  ;;  %p20_p11 = scmp.ge.s32.totalorder %s646_s18, 4   ;;  %s850_s12 = smov %s588_s13 }
 0x13e   : > { %s851_s13 = smov %s592_s14  ;;  %s852_s14 = smov %s658_s21 }
 0x13f   : > { %s853_s15 = smov %s646_s18  ;;  %22 = sbr.rel (!%p20_p11) target bundleno = 7 (0x7), region = 98 }
 0x146   :  { %312 = vsyncpa [#allocation3], 1 }
 0x147   :  { %314 = vsyncpa [#allocation3 + $0x1], 1 }
 0x148   :  { %315 = vsyncpa [#allocation6], 1 }
 0x149   :  { %317 = vsyncpa [#allocation6 + $0x1], 1 }
 0x14a   :  { %318 = vsyncpa [#allocation4], 1 }
 0x14b   :  { %320 = vsyncpa [#allocation4 + $0x1], 1 }

</bundles_post_ra>
